<compile_context>
chip_gen: v6e
topology: v6e:2x2x1
jax: 0.10.0
libtpu: 0.0.40
codegen_flags: <defaults>
</compile_context>

<pallas_src>
import math
import functools

import jax
import jax.numpy as jnp
from jax.experimental import pallas as pl
from jax.experimental.pallas import tpu as pltpu  # noqa: F401  (TPU backend assumed)


# ----------------------------------------------------------------------------
# In-kernel helpers
# ----------------------------------------------------------------------------

def _softmax_last(s):
    s = s - jnp.max(s, axis=-1, keepdims=True)
    e = jnp.exp(s)
    # reciprocal on the EUP slot instead of a VPU divide
    return e * pl.reciprocal(jnp.sum(e, axis=-1, keepdims=True), approx=True)


def _layernorm(x, gamma, beta, eps=1e-5):
    mu = jnp.mean(x, axis=-1, keepdims=True)
    var = jnp.mean((x - mu) ** 2, axis=-1, keepdims=True)
    return (x - mu) * jax.lax.rsqrt(var + eps) * gamma + beta


# ----------------------------------------------------------------------------
# Encoder block kernel: whole batch in one call, fused QKV, batched attention
# ----------------------------------------------------------------------------

def _encoder_block_kernel(x_ref, wqkv, bqkv, wo, bo,
                          g1, be1, w1, b1, w2, b2, g2, be2, o_ref, *, H):
    B, C, E = x_ref.shape                      # NB: C is a multiple of 8 in this demo
    Dh = E // H
    scale = 1.0 / math.sqrt(Dh)

    x2 = x_ref[...].reshape(B * C, E)                                   # (B*C, E)
    qkv = jnp.dot(x2, wqkv[...], preferred_element_type=jnp.float32) + bqkv[...]
    qkv3 = qkv.reshape(B, C, 3 * E)                                     # (B, C, 3E)

    heads = []
    for h in range(H):                          # static unroll over heads (H=4)
        qh = qkv3[:, :, h * Dh:(h + 1) * Dh]                            # (B, C, Dh)
        kh = qkv3[:, :, E + h * Dh:E + (h + 1) * Dh]
        vh = qkv3[:, :, 2 * E + h * Dh:2 * E + (h + 1) * Dh]
        s = jnp.einsum('bqd,bkd->bqk', qh, kh,
                       preferred_element_type=jnp.float32) * scale      # (B, C, C)
        p = _softmax_last(s)
        heads.append(jnp.einsum('bqk,bkd->bqd', p, vh,
                                preferred_element_type=jnp.float32))    # (B, C, Dh)
    attn = jnp.concatenate(heads, axis=-1)                              # (B, C, E)

    attn2 = attn.reshape(B * C, E)
    attn2 = jnp.dot(attn2, wo[...], preferred_element_type=jnp.float32) + bo[...]

    x1 = _layernorm(x2 + attn2, g1[...], be1[...])                      # (B*C, E)
    h1 = jnp.maximum(
        jnp.dot(x1, w1[...], preferred_element_type=jnp.float32) + b1[...], 0.0)
    ffn = jnp.dot(h1, w2[...], preferred_element_type=jnp.float32) + b2[...]
    out = _layernorm(x1 + ffn, g2[...], be2[...])
    o_ref[...] = out.reshape(B, C, E)


def encoder_block(x, p, H):
    B, C, E = x.shape
    kern = functools.partial(_encoder_block_kernel, H=H)
    return pl.pallas_call(
        kern,
        out_shape=jax.ShapeDtypeStruct((B, C, E), jnp.float32),
    )(x, p["wqkv"], p["bqkv"], p["wo"], p["bo"],
      p["g1"], p["be1"], p["w1"], p["b1"], p["w2"], p["b2"], p["g2"], p["be2"])


# ----------------------------------------------------------------------------
# Decoder K / V / K_final projection (hoisted out of the decode loop)
# ----------------------------------------------------------------------------

def _kvkf_kernel(enc_ref, w_ref, o_ref):
    B, C, E = enc_ref.shape
    enc2 = enc_ref[...].reshape(B * C, E)
    kvf = jnp.dot(enc2, w_ref[...], preferred_element_type=jnp.float32)  # (B*C, 3E)
    o_ref[...] = kvf.reshape(B, C, w_ref.shape[1])


def kvkf_project(enc_out, w):
    B, C, _ = enc_out.shape
    return pl.pallas_call(
        _kvkf_kernel,
        out_shape=jax.ShapeDtypeStruct((B, C, w.shape[1]), jnp.float32),
    )(enc_out, w)


# ----------------------------------------------------------------------------
# Decoder step kernel: whole batch per call, K/V/Kf passed in precomputed,
# lane-dense (B, C) logits output.
# ----------------------------------------------------------------------------

def _decoder_kernel(mean_ref, h0_ref, hprev_ref, mask_ref, kvf_ref,
                    wc, bc, wq, wo, o_ref, *, H):
    B, C, E3 = kvf_ref.shape
    E = E3 // 3
    Dh = E // H
    scale = 1.0 / math.sqrt(Dh)
    neg = jnp.float32(-1e9)

    mask = mask_ref[...]                                                 # (B, C)
    kvf = kvf_ref[...]                                                   # (B, C, 3E)

    # context query from [graph-mean, first-city, last-city]
    ctx = jnp.concatenate([mean_ref[...], h0_ref[...], hprev_ref[...]], axis=-1)  # (B, 3E)
    ctx = jnp.dot(ctx, wc[...], preferred_element_type=jnp.float32) + bc[...]     # (B, E)
    q = jnp.dot(ctx, wq[...], preferred_element_type=jnp.float32)                 # (B, E)

    heads = []
    for h in range(H):                           # static unroll; query has a single row
        qh = q[:, h * Dh:(h + 1) * Dh]                                   # (B, Dh)
        kh = kvf[:, :, h * Dh:(h + 1) * Dh]                              # (B, C, Dh)
        vh = kvf[:, :, E + h * Dh:E + (h + 1) * Dh]                      # (B, C, Dh)
        s = jnp.sum(qh[:, None, :] * kh, axis=-1) * scale                # (B, C)  (VPU)
        s = jnp.where(mask > 0.5, neg, s)
        p = _softmax_last(s)                                             # (B, C)
        heads.append(jnp.sum(p[:, :, None] * vh, axis=1))                # (B, Dh)
    glimpse = jnp.concatenate(heads, axis=-1)                            # (B, E)

    qf = jnp.dot(glimpse, wo[...], preferred_element_type=jnp.float32)   # (B, E)
    kf = kvf[:, :, 2 * E:]                                               # (B, C, E)
    logits = jnp.sum(qf[:, None, :] * kf, axis=-1) / math.sqrt(E)        # (B, C)
    logits = 10.0 * jnp.tanh(logits)
    logits = jnp.where(mask > 0.5, neg, logits)
    o_ref[...] = logits                                                  # (B, C)


def decoder_mha(enc_mean, h0, hprev, mask, kvf, p, H):
    B, C, _ = kvf.shape
    kern = functools.partial(_decoder_kernel, H=H)
    return pl.pallas_call(
        kern,
        out_shape=jax.ShapeDtypeStruct((B, C), jnp.float32),
    )(enc_mean, h0, hprev, mask, kvf, p["wc"], p["bc"], p["wq"], p["wo"])


# ----------------------------------------------------------------------------
# Parameters (deterministic synthetic init)
# ----------------------------------------------------------------------------

def init_params(key, Nx, embed, heads):
    keys = iter(jax.random.split(key, 8 * Nx + 16))

    def nrm(shape, scale=0.1):
        return scale * jax.random.normal(next(keys), shape, dtype=jnp.float32)

    F = 4 * embed
    params = {
        "emb_w": nrm((2, embed)),
        "emb_b": nrm((1, embed)),
        "v1": nrm((embed,)),
        "vf": nrm((embed,)),
        "blocks": [],
        "heads": heads,
    }
    for _ in range(Nx):
        params["blocks"].append({
            "wqkv": nrm((embed, 3 * embed)),          # fused [Wq | Wk | Wv]
            "bqkv": nrm((1, 3 * embed)),
            "wo": nrm((embed, embed)), "bo": nrm((1, embed)),
            "g1": jnp.ones((1, embed), jnp.float32),
            "be1": jnp.zeros((1, embed), jnp.float32),
            "w1": nrm((embed, F)), "b1": nrm((1, F)),
            "w2": nrm((F, embed)), "b2": nrm((1, embed)),
            "g2": jnp.ones((1, embed), jnp.float32),
            "be2": jnp.zeros((1, embed), jnp.float32),
        })
    params["dec"] = {
        "wc": nrm((3 * embed, embed)), "bc": nrm((1, embed)),
        "wq": nrm((embed, embed)),
        "wo": nrm((embed, embed)),
        "wkvf": nrm((embed, 3 * embed)),              # fused [Wk | Wv | Wk_final]
    }
    return params


# ----------------------------------------------------------------------------
# Forward pass (mirrors Transformer.forward)
# ----------------------------------------------------------------------------

def transformer_forward(x, params, sample=True, key=None):
    B, C, _ = x.shape
    E = params["emb_w"].shape[1]
    H = params["heads"]

    # embedding: Linear(2, embed) — K=2, left in XLA (MXU would be almost entirely idle)
    x_embed = jnp.matmul(x, params["emb_w"]) + params["emb_b"]           # (B, C, E)

    # encoder stack — one pallas_call per block over the whole batch
    enc_out = x_embed
    for blk in params["blocks"]:
        enc_out = encoder_block(enc_out, blk, H)

    # note: torch code takes the mean of x_embed (not enc_out) — reproduce exactly
    enc_out_mean = jnp.mean(x_embed, axis=1)                             # (B, E)

    # decoder K / V / K_final computed ONCE per forward pass (hoisted out of the loop)
    kvf = kvkf_project(enc_out, params["dec"]["wkvf"])                   # (B, C, 3E)

    h0 = jnp.broadcast_to(params["v1"][None, :], (B, E))
    hprev = jnp.broadcast_to(params["vf"][None, :], (B, E))
    mask = jnp.zeros((B, C), jnp.float32)
    log_l = jnp.zeros((B, C), jnp.float32)
    tour = []

    for i in range(C):
        logits = decoder_mha(enc_out_mean, h0, hprev, mask, kvf,
                             params["dec"], H)                           # (B, C)
        log_p = jax.nn.log_softmax(logits, axis=1)
        if sample:
            key, sub = jax.random.split(key)
            next_city = jax.random.categorical(sub, log_p, axis=1)       # (B,)
        else:
            next_city = jnp.argmax(log_p, axis=1)
        nc = next_city[:, None]                                          # (B, 1)
        sel = enc_out[jnp.arange(B), next_city]                          # (B, E)
        if i == 0:
            h0 = sel
        mask = mask + jax.nn.one_hot(next_city, C, dtype=jnp.float32)
        hprev = sel
        # torch broadcasts the (B,1) gathered log-prob over all city columns
        log_l = log_l + jnp.take_along_axis(log_p, nc, axis=1)
        tour.append(nc)

    log_l_sum = jnp.sum(log_l, axis=1)                                   # (B,)
    tour = jnp.stack(tour, axis=1)                                       # (B, C, 1)
    out_tour = jnp.take_along_axis(x, jnp.broadcast_to(tour, (B, C, 2)), axis=1)
    return out_tour, log_l_sum


# ----------------------------------------------------------------------------

if __name__ == "__main__":
    Nx, embed, heads = 2, 32, 4
    batch, city = 2, 8          # city kept a multiple of 8 (sublane-aligned reshapes)

    key = jax.random.PRNGKey(0)
    kp, kx, ks = jax.random.split(key, 3)

    params = init_params(kp, Nx, embed, heads)
    x = jax.random.uniform(kx, (batch, city, 2), dtype=jnp.float32)

    out_tour, log_l_sum = transformer_forward(x, params, sample=True, key=ks)
    jax.block_until_ready((out_tour, log_l_sum))

    assert out_tour.shape == (batch, city, 2)
    assert log_l_sum.shape == (batch,)
    print("KERNEL_OK")
</pallas_src>

<mosaic_0001>
module attributes {stable_mosaic.version = 11 : i64} {
  func.func @_encoder_block_kernel(%arg0: memref<2x8x32xf32, #tpu.memory_space<vmem>>, %arg1: memref<32x96xf32, #tpu.memory_space<vmem>>, %arg2: memref<1x96xf32, #tpu.memory_space<vmem>>, %arg3: memref<32x32xf32, #tpu.memory_space<vmem>>, %arg4: memref<1x32xf32, #tpu.memory_space<vmem>>, %arg5: memref<1x32xf32, #tpu.memory_space<vmem>>, %arg6: memref<1x32xf32, #tpu.memory_space<vmem>>, %arg7: memref<32x128xf32, #tpu.memory_space<vmem>>, %arg8: memref<1x128xf32, #tpu.memory_space<vmem>>, %arg9: memref<128x32xf32, #tpu.memory_space<vmem>>, %arg10: memref<1x32xf32, #tpu.memory_space<vmem>>, %arg11: memref<1x32xf32, #tpu.memory_space<vmem>>, %arg12: memref<1x32xf32, #tpu.memory_space<vmem>>, %arg13: memref<2x8x32xf32, #tpu.memory_space<vmem>>) attributes {dimension_semantics = [], scalar_prefetch = 0 : i64, scratch_operands = 0 : i64, tpu.core_type = #tpu.core_type<tc>} {
    %c0 = arith.constant 0 : index
    %c0_0 = arith.constant 0 : index
    %c0_1 = arith.constant 0 : index
    %0 = vector.load %arg0[%c0, %c0_0, %c0_1] : memref<2x8x32xf32, #tpu.memory_space<vmem>>, vector<2x8x32xf32>
    %1 = vector.shape_cast %0 : vector<2x8x32xf32> to vector<16x32xf32>
    %c0_2 = arith.constant 0 : index
    %c0_3 = arith.constant 0 : index
    %2 = vector.load %arg1[%c0_2, %c0_3] : memref<32x96xf32, #tpu.memory_space<vmem>>, vector<32x96xf32>
    %cst = arith.constant dense<0.000000e+00> : vector<16x96xf32>
    %3 = tpu.matmul %1, %2, %cst {dimension_numbers = #tpu.dot_dimension_numbers<[1], [0], [0], [1], [0, 0, 1, 1], [], []>} : vector<16x32xf32>, vector<32x96xf32>, vector<16x96xf32> -> vector<16x96xf32>
    %c0_4 = arith.constant 0 : index
    %c0_5 = arith.constant 0 : index
    %4 = vector.load %arg2[%c0_4, %c0_5] : memref<1x96xf32, #tpu.memory_space<vmem>>, vector<1x96xf32>
    %5 = vector.broadcast %4 : vector<1x96xf32> to vector<16x96xf32>
    %6 = arith.addf %3, %5 : vector<16x96xf32>
    %7 = vector.shape_cast %6 : vector<16x96xf32> to vector<2x8x96xf32>
    %8 = vector.extract_strided_slice %7 {offsets = [0, 0, 0], sizes = [2, 8, 8], strides = [1, 1, 1]} : vector<2x8x96xf32> to vector<2x8x8xf32>
    %9 = vector.extract_strided_slice %7 {offsets = [0, 0, 32], sizes = [2, 8, 8], strides = [1, 1, 1]} : vector<2x8x96xf32> to vector<2x8x8xf32>
    %10 = vector.extract_strided_slice %7 {offsets = [0, 0, 64], sizes = [2, 8, 8], strides = [1, 1, 1]} : vector<2x8x96xf32> to vector<2x8x8xf32>
    "tpu.trace_start"() <{level = 10 : i32, message = "bqd,bkd->bqk"}> : () -> ()
    %cst_6 = arith.constant dense<0.000000e+00> : vector<2x8x8xf32>
    %11 = tpu.matmul %8, %9, %cst_6 {dimension_numbers = #tpu.dot_dimension_numbers<[2], [2], [1], [1], [0, 0, 0, 1, 1, 1], [0], [0]>} : vector<2x8x8xf32>, vector<2x8x8xf32>, vector<2x8x8xf32> -> vector<2x8x8xf32>
    "tpu.trace_stop"() : () -> ()
    %cst_7 = arith.constant 0.353553385 : f32
    %12 = vector.broadcast %cst_7 : f32 to vector<2x8x8xf32>
    %13 = arith.mulf %11, %12 : vector<2x8x8xf32>
    %cst_8 = arith.constant dense<0xFF800000> : vector<2x8xf32>
    %14 = vector.multi_reduction <maximumf>, %13, %cst_8 [2] : vector<2x8x8xf32> to vector<2x8xf32>
    %15 = vector.shape_cast %14 : vector<2x8xf32> to vector<2x8x1xf32>
    %16 = vector.broadcast %15 : vector<2x8x1xf32> to vector<2x8x8xf32>
    %17 = arith.subf %13, %16 : vector<2x8x8xf32>
    %18 = math.exp %17 : vector<2x8x8xf32>
    %cst_9 = arith.constant dense<0.000000e+00> : vector<2x8xf32>
    %19 = vector.multi_reduction <add>, %18, %cst_9 [2] : vector<2x8x8xf32> to vector<2x8xf32>
    %20 = vector.shape_cast %19 : vector<2x8xf32> to vector<2x8x1xf32>
    %21 = tpu.reciprocal %20 {approx = true} : vector<2x8x1xf32> -> vector<2x8x1xf32>
    %22 = vector.broadcast %21 : vector<2x8x1xf32> to vector<2x8x8xf32>
    %23 = arith.mulf %18, %22 : vector<2x8x8xf32>
    "tpu.trace_start"() <{level = 10 : i32, message = "bqk,bkd->bqd"}> : () -> ()
    %cst_10 = arith.constant dense<0.000000e+00> : vector<2x8x8xf32>
    %24 = tpu.matmul %23, %10, %cst_10 {dimension_numbers = #tpu.dot_dimension_numbers<[2], [1], [1], [2], [0, 0, 0, 1, 1, 2], [0], [0]>} : vector<2x8x8xf32>, vector<2x8x8xf32>, vector<2x8x8xf32> -> vector<2x8x8xf32>
    "tpu.trace_stop"() : () -> ()
    %25 = vector.extract_strided_slice %7 {offsets = [0, 0, 8], sizes = [2, 8, 8], strides = [1, 1, 1]} : vector<2x8x96xf32> to vector<2x8x8xf32>
    %26 = vector.extract_strided_slice %7 {offsets = [0, 0, 40], sizes = [2, 8, 8], strides = [1, 1, 1]} : vector<2x8x96xf32> to vector<2x8x8xf32>
    %27 = vector.extract_strided_slice %7 {offsets = [0, 0, 72], sizes = [2, 8, 8], strides = [1, 1, 1]} : vector<2x8x96xf32> to vector<2x8x8xf32>
    "tpu.trace_start"() <{level = 10 : i32, message = "bqd,bkd->bqk"}> : () -> ()
    %cst_11 = arith.constant dense<0.000000e+00> : vector<2x8x8xf32>
    %28 = tpu.matmul %25, %26, %cst_11 {dimension_numbers = #tpu.dot_dimension_numbers<[2], [2], [1], [1], [0, 0, 0, 1, 1, 1], [0], [0]>} : vector<2x8x8xf32>, vector<2x8x8xf32>, vector<2x8x8xf32> -> vector<2x8x8xf32>
    "tpu.trace_stop"() : () -> ()
    %cst_12 = arith.constant 0.353553385 : f32
    %29 = vector.broadcast %cst_12 : f32 to vector<2x8x8xf32>
    %30 = arith.mulf %28, %29 : vector<2x8x8xf32>
    %cst_13 = arith.constant dense<0xFF800000> : vector<2x8xf32>
    %31 = vector.multi_reduction <maximumf>, %30, %cst_13 [2] : vector<2x8x8xf32> to vector<2x8xf32>
    %32 = vector.shape_cast %31 : vector<2x8xf32> to vector<2x8x1xf32>
    %33 = vector.broadcast %32 : vector<2x8x1xf32> to vector<2x8x8xf32>
    %34 = arith.subf %30, %33 : vector<2x8x8xf32>
    %35 = math.exp %34 : vector<2x8x8xf32>
    %cst_14 = arith.constant dense<0.000000e+00> : vector<2x8xf32>
    %36 = vector.multi_reduction <add>, %35, %cst_14 [2] : vector<2x8x8xf32> to vector<2x8xf32>
    %37 = vector.shape_cast %36 : vector<2x8xf32> to vector<2x8x1xf32>
    %38 = tpu.reciprocal %37 {approx = true} : vector<2x8x1xf32> -> vector<2x8x1xf32>
    %39 = vector.broadcast %38 : vector<2x8x1xf32> to vector<2x8x8xf32>
    %40 = arith.mulf %35, %39 : vector<2x8x8xf32>
    "tpu.trace_start"() <{level = 10 : i32, message = "bqk,bkd->bqd"}> : () -> ()
    %cst_15 = arith.constant dense<0.000000e+00> : vector<2x8x8xf32>
    %41 = tpu.matmul %40, %27, %cst_15 {dimension_numbers = #tpu.dot_dimension_numbers<[2], [1], [1], [2], [0, 0, 0, 1, 1, 2], [0], [0]>} : vector<2x8x8xf32>, vector<2x8x8xf32>, vector<2x8x8xf32> -> vector<2x8x8xf32>
    "tpu.trace_stop"() : () -> ()
    %42 = vector.extract_strided_slice %7 {offsets = [0, 0, 16], sizes = [2, 8, 8], strides = [1, 1, 1]} : vector<2x8x96xf32> to vector<2x8x8xf32>
    %43 = vector.extract_strided_slice %7 {offsets = [0, 0, 48], sizes = [2, 8, 8], strides = [1, 1, 1]} : vector<2x8x96xf32> to vector<2x8x8xf32>
    %44 = vector.extract_strided_slice %7 {offsets = [0, 0, 80], sizes = [2, 8, 8], strides = [1, 1, 1]} : vector<2x8x96xf32> to vector<2x8x8xf32>
    "tpu.trace_start"() <{level = 10 : i32, message = "bqd,bkd->bqk"}> : () -> ()
    %cst_16 = arith.constant dense<0.000000e+00> : vector<2x8x8xf32>
    %45 = tpu.matmul %42, %43, %cst_16 {dimension_numbers = #tpu.dot_dimension_numbers<[2], [2], [1], [1], [0, 0, 0, 1, 1, 1], [0], [0]>} : vector<2x8x8xf32>, vector<2x8x8xf32>, vector<2x8x8xf32> -> vector<2x8x8xf32>
    "tpu.trace_stop"() : () -> ()
    %cst_17 = arith.constant 0.353553385 : f32
    %46 = vector.broadcast %cst_17 : f32 to vector<2x8x8xf32>
    %47 = arith.mulf %45, %46 : vector<2x8x8xf32>
    %cst_18 = arith.constant dense<0xFF800000> : vector<2x8xf32>
    %48 = vector.multi_reduction <maximumf>, %47, %cst_18 [2] : vector<2x8x8xf32> to vector<2x8xf32>
    %49 = vector.shape_cast %48 : vector<2x8xf32> to vector<2x8x1xf32>
    %50 = vector.broadcast %49 : vector<2x8x1xf32> to vector<2x8x8xf32>
    %51 = arith.subf %47, %50 : vector<2x8x8xf32>
    %52 = math.exp %51 : vector<2x8x8xf32>
    %cst_19 = arith.constant dense<0.000000e+00> : vector<2x8xf32>
    %53 = vector.multi_reduction <add>, %52, %cst_19 [2] : vector<2x8x8xf32> to vector<2x8xf32>
    %54 = vector.shape_cast %53 : vector<2x8xf32> to vector<2x8x1xf32>
    %55 = tpu.reciprocal %54 {approx = true} : vector<2x8x1xf32> -> vector<2x8x1xf32>
    %56 = vector.broadcast %55 : vector<2x8x1xf32> to vector<2x8x8xf32>
    %57 = arith.mulf %52, %56 : vector<2x8x8xf32>
    "tpu.trace_start"() <{level = 10 : i32, message = "bqk,bkd->bqd"}> : () -> ()
    %cst_20 = arith.constant dense<0.000000e+00> : vector<2x8x8xf32>
    %58 = tpu.matmul %57, %44, %cst_20 {dimension_numbers = #tpu.dot_dimension_numbers<[2], [1], [1], [2], [0, 0, 0, 1, 1, 2], [0], [0]>} : vector<2x8x8xf32>, vector<2x8x8xf32>, vector<2x8x8xf32> -> vector<2x8x8xf32>
    "tpu.trace_stop"() : () -> ()
    %59 = vector.extract_strided_slice %7 {offsets = [0, 0, 24], sizes = [2, 8, 8], strides = [1, 1, 1]} : vector<2x8x96xf32> to vector<2x8x8xf32>
    %60 = vector.extract_strided_slice %7 {offsets = [0, 0, 56], sizes = [2, 8, 8], strides = [1, 1, 1]} : vector<2x8x96xf32> to vector<2x8x8xf32>
    %61 = vector.extract_strided_slice %7 {offsets = [0, 0, 88], sizes = [2, 8, 8], strides = [1, 1, 1]} : vector<2x8x96xf32> to vector<2x8x8xf32>
    "tpu.trace_start"() <{level = 10 : i32, message = "bqd,bkd->bqk"}> : () -> ()
    %cst_21 = arith.constant dense<0.000000e+00> : vector<2x8x8xf32>
    %62 = tpu.matmul %59, %60, %cst_21 {dimension_numbers = #tpu.dot_dimension_numbers<[2], [2], [1], [1], [0, 0, 0, 1, 1, 1], [0], [0]>} : vector<2x8x8xf32>, vector<2x8x8xf32>, vector<2x8x8xf32> -> vector<2x8x8xf32>
    "tpu.trace_stop"() : () -> ()
    %cst_22 = arith.constant 0.353553385 : f32
    %63 = vector.broadcast %cst_22 : f32 to vector<2x8x8xf32>
    %64 = arith.mulf %62, %63 : vector<2x8x8xf32>
    %cst_23 = arith.constant dense<0xFF800000> : vector<2x8xf32>
    %65 = vector.multi_reduction <maximumf>, %64, %cst_23 [2] : vector<2x8x8xf32> to vector<2x8xf32>
    %66 = vector.shape_cast %65 : vector<2x8xf32> to vector<2x8x1xf32>
    %67 = vector.broadcast %66 : vector<2x8x1xf32> to vector<2x8x8xf32>
    %68 = arith.subf %64, %67 : vector<2x8x8xf32>
    %69 = math.exp %68 : vector<2x8x8xf32>
    %cst_24 = arith.constant dense<0.000000e+00> : vector<2x8xf32>
    %70 = vector.multi_reduction <add>, %69, %cst_24 [2] : vector<2x8x8xf32> to vector<2x8xf32>
    %71 = vector.shape_cast %70 : vector<2x8xf32> to vector<2x8x1xf32>
    %72 = tpu.reciprocal %71 {approx = true} : vector<2x8x1xf32> -> vector<2x8x1xf32>
    %73 = vector.broadcast %72 : vector<2x8x1xf32> to vector<2x8x8xf32>
    %74 = arith.mulf %69, %73 : vector<2x8x8xf32>
    "tpu.trace_start"() <{level = 10 : i32, message = "bqk,bkd->bqd"}> : () -> ()
    %cst_25 = arith.constant dense<0.000000e+00> : vector<2x8x8xf32>
    %75 = tpu.matmul %74, %61, %cst_25 {dimension_numbers = #tpu.dot_dimension_numbers<[2], [1], [1], [2], [0, 0, 0, 1, 1, 2], [0], [0]>} : vector<2x8x8xf32>, vector<2x8x8xf32>, vector<2x8x8xf32> -> vector<2x8x8xf32>
    "tpu.trace_stop"() : () -> ()
    %76 = tpu.concatenate %24, %41, %58, %75 in 2 : vector<2x8x8xf32>, vector<2x8x8xf32>, vector<2x8x8xf32>, vector<2x8x8xf32> -> vector<2x8x32xf32>
    %77 = vector.shape_cast %76 : vector<2x8x32xf32> to vector<16x32xf32>
    %c0_26 = arith.constant 0 : index
    %c0_27 = arith.constant 0 : index
    %78 = vector.load %arg3[%c0_26, %c0_27] : memref<32x32xf32, #tpu.memory_space<vmem>>, vector<32x32xf32>
    %cst_28 = arith.constant dense<0.000000e+00> : vector<16x32xf32>
    %79 = tpu.matmul %77, %78, %cst_28 {dimension_numbers = #tpu.dot_dimension_numbers<[1], [0], [0], [1], [0, 0, 1, 1], [], []>} : vector<16x32xf32>, vector<32x32xf32>, vector<16x32xf32> -> vector<16x32xf32>
    %c0_29 = arith.constant 0 : index
    %c0_30 = arith.constant 0 : index
    %80 = vector.load %arg4[%c0_29, %c0_30] : memref<1x32xf32, #tpu.memory_space<vmem>>, vector<1x32xf32>
    %81 = vector.broadcast %80 : vector<1x32xf32> to vector<16x32xf32>
    %82 = arith.addf %79, %81 : vector<16x32xf32>
    %83 = arith.addf %1, %82 : vector<16x32xf32>
    %c0_31 = arith.constant 0 : index
    %c0_32 = arith.constant 0 : index
    %84 = vector.load %arg5[%c0_31, %c0_32] : memref<1x32xf32, #tpu.memory_space<vmem>>, vector<1x32xf32>
    %c0_33 = arith.constant 0 : index
    %c0_34 = arith.constant 0 : index
    %85 = vector.load %arg6[%c0_33, %c0_34] : memref<1x32xf32, #tpu.memory_space<vmem>>, vector<1x32xf32>
    %cst_35 = arith.constant dense<0.000000e+00> : vector<16xf32>
    %86 = vector.multi_reduction <add>, %83, %cst_35 [1] : vector<16x32xf32> to vector<16xf32>
    %87 = vector.shape_cast %86 : vector<16xf32> to vector<16x1xf32>
    %cst_36 = arith.constant 3.200000e+01 : f32
    %88 = vector.broadcast %cst_36 : f32 to vector<16x1xf32>
    %89 = arith.divf %87, %88 : vector<16x1xf32>
    %90 = vector.broadcast %89 : vector<16x1xf32> to vector<16x32xf32>
    %91 = arith.subf %83, %90 : vector<16x32xf32>
    %92 = arith.mulf %91, %91 : vector<16x32xf32>
    %cst_37 = arith.constant dense<0.000000e+00> : vector<16xf32>
    %93 = vector.multi_reduction <add>, %92, %cst_37 [1] : vector<16x32xf32> to vector<16xf32>
    %94 = vector.shape_cast %93 : vector<16xf32> to vector<16x1xf32>
    %cst_38 = arith.constant 3.200000e+01 : f32
    %95 = vector.broadcast %cst_38 : f32 to vector<16x1xf32>
    %96 = arith.divf %94, %95 : vector<16x1xf32>
    %97 = vector.broadcast %89 : vector<16x1xf32> to vector<16x32xf32>
    %98 = arith.subf %83, %97 : vector<16x32xf32>
    %cst_39 = arith.constant 9.99999974E-6 : f32
    %99 = vector.broadcast %cst_39 : f32 to vector<16x1xf32>
    %100 = arith.addf %96, %99 : vector<16x1xf32>
    %101 = math.rsqrt %100 : vector<16x1xf32>
    %102 = vector.broadcast %101 : vector<16x1xf32> to vector<16x32xf32>
    %103 = arith.mulf %98, %102 : vector<16x32xf32>
    %104 = vector.broadcast %84 : vector<1x32xf32> to vector<16x32xf32>
    %105 = arith.mulf %103, %104 : vector<16x32xf32>
    %106 = vector.broadcast %85 : vector<1x32xf32> to vector<16x32xf32>
    %107 = arith.addf %105, %106 : vector<16x32xf32>
    %c0_40 = arith.constant 0 : index
    %c0_41 = arith.constant 0 : index
    %108 = vector.load %arg7[%c0_40, %c0_41] : memref<32x128xf32, #tpu.memory_space<vmem>>, vector<32x128xf32>
    %cst_42 = arith.constant dense<0.000000e+00> : vector<16x128xf32>
    %109 = tpu.matmul %107, %108, %cst_42 {dimension_numbers = #tpu.dot_dimension_numbers<[1], [0], [0], [1], [0, 0, 1, 1], [], []>} : vector<16x32xf32>, vector<32x128xf32>, vector<16x128xf32> -> vector<16x128xf32>
    %c0_43 = arith.constant 0 : index
    %c0_44 = arith.constant 0 : index
    %110 = vector.load %arg8[%c0_43, %c0_44] : memref<1x128xf32, #tpu.memory_space<vmem>>, vector<1x128xf32>
    %111 = vector.broadcast %110 : vector<1x128xf32> to vector<16x128xf32>
    %112 = arith.addf %109, %111 : vector<16x128xf32>
    %cst_45 = arith.constant 0.000000e+00 : f32
    %113 = vector.broadcast %cst_45 : f32 to vector<16x128xf32>
    %114 = arith.maximumf %112, %113 : vector<16x128xf32>
    %c0_46 = arith.constant 0 : index
    %c0_47 = arith.constant 0 : index
    %115 = vector.load %arg9[%c0_46, %c0_47] : memref<128x32xf32, #tpu.memory_space<vmem>>, vector<128x32xf32>
    %cst_48 = arith.constant dense<0.000000e+00> : vector<16x32xf32>
    %116 = tpu.matmul %114, %115, %cst_48 {dimension_numbers = #tpu.dot_dimension_numbers<[1], [0], [0], [1], [0, 0, 1, 1], [], []>} : vector<16x128xf32>, vector<128x32xf32>, vector<16x32xf32> -> vector<16x32xf32>
    %c0_49 = arith.constant 0 : index
    %c0_50 = arith.constant 0 : index
    %117 = vector.load %arg10[%c0_49, %c0_50] : memref<1x32xf32, #tpu.memory_space<vmem>>, vector<1x32xf32>
    %118 = vector.broadcast %117 : vector<1x32xf32> to vector<16x32xf32>
    %119 = arith.addf %116, %118 : vector<16x32xf32>
    %120 = arith.addf %107, %119 : vector<16x32xf32>
    %c0_51 = arith.constant 0 : index
    %c0_52 = arith.constant 0 : index
    %121 = vector.load %arg11[%c0_51, %c0_52] : memref<1x32xf32, #tpu.memory_space<vmem>>, vector<1x32xf32>
    %c0_53 = arith.constant 0 : index
    %c0_54 = arith.constant 0 : index
    %122 = vector.load %arg12[%c0_53, %c0_54] : memref<1x32xf32, #tpu.memory_space<vmem>>, vector<1x32xf32>
    %cst_55 = arith.constant dense<0.000000e+00> : vector<16xf32>
    %123 = vector.multi_reduction <add>, %120, %cst_55 [1] : vector<16x32xf32> to vector<16xf32>
    %124 = vector.shape_cast %123 : vector<16xf32> to vector<16x1xf32>
    %cst_56 = arith.constant 3.200000e+01 : f32
    %125 = vector.broadcast %cst_56 : f32 to vector<16x1xf32>
    %126 = arith.divf %124, %125 : vector<16x1xf32>
    %127 = vector.broadcast %126 : vector<16x1xf32> to vector<16x32xf32>
    %128 = arith.subf %120, %127 : vector<16x32xf32>
    %129 = arith.mulf %128, %128 : vector<16x32xf32>
    %cst_57 = arith.constant dense<0.000000e+00> : vector<16xf32>
    %130 = vector.multi_reduction <add>, %129, %cst_57 [1] : vector<16x32xf32> to vector<16xf32>
    %131 = vector.shape_cast %130 : vector<16xf32> to vector<16x1xf32>
    %cst_58 = arith.constant 3.200000e+01 : f32
    %132 = vector.broadcast %cst_58 : f32 to vector<16x1xf32>
    %133 = arith.divf %131, %132 : vector<16x1xf32>
    %134 = vector.broadcast %126 : vector<16x1xf32> to vector<16x32xf32>
    %135 = arith.subf %120, %134 : vector<16x32xf32>
    %cst_59 = arith.constant 9.99999974E-6 : f32
    %136 = vector.broadcast %cst_59 : f32 to vector<16x1xf32>
    %137 = arith.addf %133, %136 : vector<16x1xf32>
    %138 = math.rsqrt %137 : vector<16x1xf32>
    %139 = vector.broadcast %138 : vector<16x1xf32> to vector<16x32xf32>
    %140 = arith.mulf %135, %139 : vector<16x32xf32>
    %141 = vector.broadcast %121 : vector<1x32xf32> to vector<16x32xf32>
    %142 = arith.mulf %140, %141 : vector<16x32xf32>
    %143 = vector.broadcast %122 : vector<1x32xf32> to vector<16x32xf32>
    %144 = arith.addf %142, %143 : vector<16x32xf32>
    %145 = vector.shape_cast %144 : vector<16x32xf32> to vector<2x8x32xf32>
    %c0_60 = arith.constant 0 : index
    %c0_61 = arith.constant 0 : index
    %c0_62 = arith.constant 0 : index
    %146 = vector.load %arg13[%c0_60, %c0_61, %c0_62] : memref<2x8x32xf32, #tpu.memory_space<vmem>>, vector<2x8x32xf32>
    tpu.vector_store %arg13[%c0_60, %c0_61, %c0_62], %145 {strides = array<i32>} : memref<2x8x32xf32, #tpu.memory_space<vmem>>, vector<2x8x32xf32>,
    return
  }
}

</mosaic_0001>

<bundles_post_ra>
// kernel: tpu_custom_call.1
= control target key start
LH: loop header
LB: loop body
LE: loop exit
PB: predicated region body
PF: predicated region fallthrough
CT: control target
= control target key end

     0   :  { %vm58_vm0 = vcmask 261120   ;;  %s2600_s0 = inlined_call_operand.vmem [shape: f32[2,8,32], index: 0, kind: input, shape index: {}]   ;;  %s2601_s1 = inlined_call_operand.vmem [shape: f32[32,96], index: 1, kind: input, shape index: {}]   ;;  %s2602_s2 = inlined_call_operand.vmem [shape: f32[1,96], index: 2, kind: input, shape index: {}]   ;;  %s2603_s3 = inlined_call_operand.vmem [shape: f32[32,32], index: 3, kind: input, shape index: {}]   ;;  %s2604_s4 = inlined_call_operand.vmem [shape: f32[1,32], index: 4, kind: input, shape index: {}]   ;;  %s2605_s5 = inlined_call_operand.vmem [shape: f32[1,32], index: 5, kind: input, shape index: {}]   ;;  %s2606_s6 = inlined_call_operand.vmem [shape: f32[1,32], index: 6, kind: input, shape index: {}]   ;;  %s2607_s7 = inlined_call_operand.vmem [shape: f32[32,128], index: 7, kind: input, shape index: {}]   ;;  %s2608_s8 = inlined_call_operand.vmem [shape: f32[1,128], index: 8, kind: input, shape index: {}]   ;;  %s2609_s9 = inlined_call_operand.vmem [shape: f32[128,32], index: 9, kind: input, shape index: {}]   ;;  %s2610_s10 = inlined_call_operand.vmem [shape: f32[1,32], index: 10, kind: input, shape index: {}]   ;;  %s2611_s11 = inlined_call_operand.vmem [shape: f32[1,32], index: 11, kind: input, shape index: {}]   ;;  %s2612_s12 = inlined_call_operand.vmem [shape: f32[1,32], index: 12, kind: input, shape index: {}]   ;;  %s2613_s13 = inlined_call_operand.hbm [shape: f32[2,8,32], index: 13, kind: output, shape index: {}]  }
   0x1   :  { %v50_v0 = vld [vmem:[%s2601_s1 + $0x18] sm:$0xff]  ;;  %v49_v1 = vld [vmem:[%s2601_s1 + $0x10] sm:$0xff]  ;;  %v2325_v2 = vld [vmem:[%s2600_s0] sm:$0xff] }
   0x2   :  { %2000 = vmatprep.subr.mxu1 %v50_v0  ;;  %v48_v3 = vld [vmem:[%s2601_s1 + $0x8] sm:$0xff]  ;;  %2008 = vmatprep.mubr.msk.f32.mxu1 %vm58_vm0, %v2325_v2 }
   0x3   :  { %2001 = vmatpush3.msra.mxu1 %v50_v0 }
   0x4   :  { %18 = vsyncpa [#allocation3], 0  ;;  %2002 = vmatprep.subr.mxu1 %v49_v1  ;;  %v47_v4 = vld [vmem:[%s2601_s1] sm:$0xff]  ;;  %v2338_v5 = vld [vmem:[%s2600_s0 + $0x8] sm:$0xff]  ;;  %v2228_v6 = vmov 0.0   ;;  %vm2229_vm1 = vmmov 0  }
   0x5   :  { %2003 = vmatpush3.msra.mxu1 %v49_v1  ;;  %2021 = vmatprep.subr.mxu0 %v2228_v6  ;;  %v1894_v8 = vld [vmem:[%s2602_s2] ss:$0 sm:$0xff]  ;;  %s2230_s20 = smov 96   ;;  %vm143_vm2 = vcmask 64512   ;;  %s2231_s2 = smov 64   ;;  %vm1496_vm3 = vcmask 195584  }
   0x6   :  { %2004 = vmatprep.subr.mxu1 %v48_v3  ;;  %2023 = vmatprep.mubr.msk.f32.mxu0 %vm2229_vm1, %v2228_v6  ;;  %s2232_s21 = smov 88   ;;  %s2233_s22 = smov 120   ;;  %vm1493_vm4 = vcmask 130048  }
   0x7   :  { %2005 = vmatpush3.msra.mxu1 %v48_v3  ;;  %s2234_s23 = smov 56   ;;  %s2235_s24 = smov 80  }
   0x8   :  { %2006 = vmatprep.subr.mxu1 %v47_v4  ;;  %s2236_s25 = smov 112   ;;  %s2237_s26 = smov 48  }
   0x9   :  { %2007 = vmatpush3.msra.mxu1 %v47_v4  ;;  %s2238_s27 = smov 72   ;;  %s2239_s28 = smov 104  }
   0xa   :  { %2009 = vmatmul.mubr.msk.f32.vlgmr.msra.gmra.mxu1 %vm58_vm0, %v2338_v5  ;;  %2011 = vmatprep.subr.mxu1 %v2228_v6  ;;  %s2240_s29 = smov 40   ;;  %s2241_s30 = smov 8  }
   0xb   :  { %2013 = vmatprep.mubr.msk.f32.mxu1 %vm2229_vm1, %v2228_v6  ;;  %s2242_s14 = smov 16  }
  0xca   :  { %v2010_v7 = vpop.f32.mrf.mxu1 }
  0xcb   :  { %v2354_v11 = vadd.f32 %v2010_v7, %v1894_v8 }
  0xcc   :  { %v131_v9 = vpop.f32.mrf.mxu1 }
  0xcd   :  { %v2351_v10 = vadd.f32 %v1894_v8, %v131_v9 }
  0xcf   :  { %141 = vrot.lane.b32.xlu0 %v2351_v10, %s2230_s20 }
  0xd3   :  { %219 = vrot.lane.b32.xlu0 %v2354_v11, %s2230_s20 }
 0x141   :  { %v142_v12 = vpop.permute.xlu0 %141 }
 0x142   :  { %2012 = vmatpush3.xpose.msk.msra.mxu1 %vm143_vm2, %v142_v12 }
 0x143   :  { %2016 = vmatprep.subr.mxu1 %v2228_v6 }
 0x145   :  { %2014 = vmatmul.mubr.msk.f32.vlgmr.msra.gmra.mxu1 %vm143_vm2, %v2351_v10  ;;  %v220_v13 = vpop.permute.xlu0 %219 }
 0x146   :  { %2017 = vmatpush3.xpose.msk.msra.mxu1 %vm143_vm2, %v220_v13  ;;  %2018 = vmatprep.mubr.msk.f32.mxu1 %vm2229_vm1, %v2228_v6 }
 0x147   :  { %2026 = vmatprep.subr.mxu1 %v2228_v6 }
 0x149   :  { %2019 = vmatmul.mubr.msk.f32.vlgmr.msra.gmra.mxu1 %vm143_vm2, %v2354_v11 }
 0x14a   :  { %2028 = vmatprep.mubr.msk.f32.mxu1 %vm2229_vm1, %v2228_v6 }
 0x205   :  { %v214_v14 = vpop.f32.mrf.mxu1 }
 0x206   :  { %v295_v15 = vmul.f32 0.35355338, %v214_v14 }
 0x207   :  { %v2015_v16 = vpop.f32.mrf.mxu1 }
 0x208   :  { %v297_v17 = vsel %vm143_vm2, %v295_v15, -inf }
 0x209   :  { %298 = vmax.xlane.f32.xlu1 %v297_v17  ;;  %v291_v18 = vpop.f32.mrf.mxu1 }
 0x20a   :  { %v296_v19 = vmul.f32 0.35355338, %v291_v18 }
 0x20b   :  { %v2020_v20 = vpop.f32.mrf.mxu1 }
 0x20c   :  { %v300_v21 = vsel %vm143_vm2, %v296_v19, -inf }
 0x20d   :  { %301 = vmax.xlane.f32.xlu1 %v300_v21 }
 0x21e   :  { %319 = vrot.lane.b32.xlu1 %v2351_v10, %s2231_s2 }
 0x222   :  { %395 = vrot.lane.b32.xlu1 %v2354_v11, %s2231_s2  ;;  %s2243_s2 = smov 24  }
 0x226   :  { %473 = vrot.lane.b32.xlu1 %v2351_v10, %s2232_s21 }
 0x22a   :  { %551 = vrot.lane.b32.xlu1 %v2354_v11, %s2232_s21 }
 0x292   :  { %v299_v22 = vpop.xlane.xlu1 %298 }
 0x293   :  { %v303_v23 = vsub.f32 %v295_v15, %v299_v22 }
 0x295   :  { %v305_v24 = vmul.f32 1.442695, %v303_v23 }
 0x296   :  { %v302_v25 = vpop.xlane.xlu1 %301 }
 0x297   :  { %2166 = vpow2.f32 %v305_v24  ;;  %v304_v26 = vsub.f32 %v296_v19, %v302_v25 }
 0x299   :  { %v307_v27 = vmul.f32 1.442695, %v304_v26 }
 0x29a   :  { %v320_v28 = vpop.permute.xlu1 %319 }
 0x29b   :  { %2168 = vpow2.f32 %v307_v27  ;;  %2022 = vmatpush3.msra.mxu0 %v320_v28 }
 0x29c   :  { %2031 = vmatprep.subr.mxu0 %v2228_v6 }
 0x29e   :  { %v396_v29 = vpop.permute.xlu1 %395 }
 0x29f   :  { %2027 = vmatpush3.msra.mxu1 %v396_v29 }
 0x2a0   :  { %2036 = vmatprep.subr.mxu1 %v2228_v6 }
 0x2a2   :  { %v474_v34 = vpop.permute.xlu1 %473 }
 0x2a4   :  { %v2167_v30 = vpop.eup %2166 }
 0x2a5   :  { %v309_v31 = vsel %vm143_vm2, %v2167_v30, 0.0 }
 0x2a6   :  { %310 = vadd.xlane.f32.xlu0 %v309_v31  ;;  %v552_v35 = vpop.permute.xlu1 %551 }
 0x2a8   :  { %v2169_v32 = vpop.eup %2168 }
 0x2a9   :  { %v312_v33 = vsel %vm143_vm2, %v2169_v32, 0.0 }
 0x2aa   :  { %313 = vadd.xlane.f32.xlu1 %v312_v33 }
 0x2bb   :  { %549 = vrot.lane.b32.xlu1 %v2354_v11, %s2233_s22 }
 0x2bc   :  { %471 = vrot.lane.b32.xlu0 %v2351_v10, %s2233_s22 }
 0x32f   :  { %v311_v36 = vpop.xlane.xlu0 %310 }
 0x330   :  { %2170 = vrcp.f32 %v311_v36 }
 0x333   :  { %v314_v37 = vpop.xlane.xlu1 %313  ;;  %v472_v42 = vpop.permute.xlu0 %471 }
 0x334   :  { %2172 = vrcp.f32 %v314_v37 }
 0x337   :  { %v550_v43 = vpop.permute.xlu1 %549 }
 0x33d   :  { %v2171_v38 = vpop.eup %2170 }
 0x33e   :  { %v317_v39 = vmul.f32 %v2171_v38, %v2167_v30 }
 0x340   :  { %2024 = vmatmul.mubr.msk.f32.vlgmr.msra.gmra.mxu0 %vm143_vm2, %v317_v39 }
 0x341   :  { %v2173_v40 = vpop.eup %2172  ;;  %2032 = vmatpush3.xpose.msk.msra.mxu0 %vm143_vm2, %v474_v34  ;;  %2033 = vmatprep.mubr.msk.f32.mxu0 %vm2229_vm1, %v2228_v6 }
 0x342   :  { %v318_v41 = vmul.f32 %v2173_v40, %v2169_v32  ;;  %2041 = vmatprep.subr.mxu0 %v2228_v6 }
 0x344   :  { %2029 = vmatmul.mubr.msk.f32.vlgmr.msra.gmra.mxu1 %vm143_vm2, %v318_v41  ;;  %2034 = vmatmul.mubr.msk.f32.vlgmr.msra.gmra.mxu0 %vm143_vm2, %v472_v42 }
 0x345   :  { %2037 = vmatpush3.xpose.msk.msra.mxu1 %vm143_vm2, %v552_v35  ;;  %2038 = vmatprep.mubr.msk.f32.mxu1 %vm2229_vm1, %v2228_v6 }
 0x346   :  { %2046 = vmatprep.subr.mxu1 %v2228_v6  ;;  %2043 = vmatprep.mubr.msk.f32.mxu0 %vm2229_vm1, %v2228_v6 }
 0x348   :  { %2039 = vmatmul.mubr.msk.f32.vlgmr.msra.gmra.mxu1 %vm143_vm2, %v550_v43 }
 0x349   :  { %2048 = vmatprep.mubr.msk.f32.mxu1 %vm2229_vm1, %v2228_v6 }
 0x400   :  { %v2397_v44 = vpop.f32.mrf.mxu0 }
 0x402   :  { %v2025_v45 = vpop.f32.mrf.mxu0 }
 0x404   :  { %v2399_v46 = vpop.f32.mrf.mxu1  ;;  %v545_v47 = vpop.f32.mrf.mxu0 }
 0x405   :  { %v627_v48 = vmul.f32 0.35355338, %v545_v47 }
 0x406   :  { %v2030_v49 = vpop.f32.mrf.mxu1  ;;  %v2035_v50 = vpop.f32.mrf.mxu0 }
 0x407   :  { %v629_v51 = vsel %vm143_vm2, %v627_v48, -inf }
 0x408   :  { %v623_v52 = vpop.f32.mrf.mxu1  ;;  %630 = vmax.xlane.f32.xlu1 %v629_v51 }
 0x409   :  { %v628_v53 = vmul.f32 0.35355338, %v623_v52 }
 0x40a   :  { %v2040_v54 = vpop.f32.mrf.mxu1 }
 0x40b   :  { %v632_v55 = vsel %vm143_vm2, %v628_v53, -inf }
 0x40c   :  { %633 = vmax.xlane.f32.xlu0 %v632_v55 }
 0x419   :  { %651 = vrot.lane.b32.xlu1 %v2351_v10, %s2234_s23 }
 0x41d   :  { %805 = vrot.lane.b32.xlu1 %v2351_v10, %s2235_s24 }
 0x421   :  { %883 = vrot.lane.b32.xlu1 %v2354_v11, %s2235_s24  ;;  %s2244_s24 = smov [#allocation2]  }
 0x422   :  { %727 = vrot.lane.b32.xlu0 %v2354_v11, %s2234_s23 }
 0x426   :  { %803 = vrot.lane.b32.xlu0 %v2351_v10, %s2236_s25 }
 0x491   :  { %v631_v56 = vpop.xlane.xlu1 %630 }
 0x492   :  { %v635_v57 = vsub.f32 %v627_v48, %v631_v56 }
 0x494   :  { %v637_v58 = vmul.f32 1.442695, %v635_v57 }
 0x495   :  { %v652_v59 = vpop.permute.xlu1 %651  ;;  %v634_v60 = vpop.xlane.xlu0 %633 }
 0x496   :  { %2174 = vpow2.f32 %v637_v58  ;;  %v636_v61 = vsub.f32 %v628_v53, %v634_v60  ;;  %2042 = vmatpush3.msra.mxu0 %v652_v59 }
 0x497   :  { %2051 = vmatprep.subr.mxu0 %v2228_v6 }
 0x498   :  { %v639_v62 = vmul.f32 1.442695, %v636_v61 }
 0x499   :  { %v728_v63 = vpop.permute.xlu0 %727  ;;  %v806_v7 = vpop.permute.xlu1 %805 }
 0x49a   :  { %2176 = vpow2.f32 %v639_v62  ;;  %2047 = vmatpush3.msra.mxu1 %v728_v63 }
 0x49b   :  { %2056 = vmatprep.subr.mxu1 %v2228_v6 }
 0x49d   :  { %v884_v8 = vpop.permute.xlu1 %883  ;;  %v804_v17 = vpop.permute.xlu0 %803 }
 0x4a3   :  { %v2175_v0 = vpop.eup %2174 }
 0x4a4   :  { %v641_v1 = vsel %vm143_vm2, %v2175_v0, 0.0 }
 0x4a5   :  { %642 = vadd.xlane.f32.xlu1 %v641_v1 }
 0x4a7   :  { %v2177_v3 = vpop.eup %2176 }
 0x4a8   :  { %v644_v4 = vsel %vm143_vm2, %v2177_v3, 0.0 }
 0x4a9   :  { %645 = vadd.xlane.f32.xlu1 %v644_v4 }
 0x4ba   :  { %881 = vrot.lane.b32.xlu1 %v2354_v11, %s2236_s25  ;;  %s1883_s25 = sshll.u32 %s2244_s24, 4  ;;  %s1884_s25 = int_to_ptr.vmem [resolvable:$true] %s1883_s25 }
 0x4bb   :  { %p2211_p1 = scmp.lt.s32.totalorder %s1884_s25, %s1884_s25 }
 0x52e   :  { %v643_v9 = vpop.xlane.xlu1 %642 }
 0x52f   :  { %2178 = vrcp.f32 %v643_v9 }
 0x532   :  { %v646_v12 = vpop.xlane.xlu1 %645 }
 0x533   :  { %2180 = vrcp.f32 %v646_v12 }
 0x536   :  { %v882_v18 = vpop.permute.xlu1 %881 }
 0x53c   :  { %v2179_v13 = vpop.eup %2178 }
 0x53d   :  { %v649_v14 = vmul.f32 %v2179_v13, %v2175_v0 }
 0x53f   :  { %2044 = vmatmul.mubr.msk.f32.vlgmr.msra.gmra.mxu0 %vm143_vm2, %v649_v14 }
 0x540   :  { %v2181_v15 = vpop.eup %2180  ;;  %2052 = vmatpush3.xpose.msk.msra.mxu0 %vm143_vm2, %v806_v7  ;;  %2053 = vmatprep.mubr.msk.f32.mxu0 %vm2229_vm1, %v2228_v6 }
 0x541   :  { %v650_v16 = vmul.f32 %v2181_v15, %v2177_v3  ;;  %2061 = vmatprep.subr.mxu0 %v2228_v6 }
 0x543   :  { %2049 = vmatmul.mubr.msk.f32.vlgmr.msra.gmra.mxu1 %vm143_vm2, %v650_v16  ;;  %2054 = vmatmul.mubr.msk.f32.vlgmr.msra.gmra.mxu0 %vm143_vm2, %v804_v17 }
 0x544   :  { %2057 = vmatpush3.xpose.msk.msra.mxu1 %vm143_vm2, %v884_v8  ;;  %2058 = vmatprep.mubr.msk.f32.mxu1 %vm2229_vm1, %v2228_v6 }
 0x545   :  { %2066 = vmatprep.subr.mxu1 %v2228_v6  ;;  %2063 = vmatprep.mubr.msk.f32.mxu0 %vm2229_vm1, %v2228_v6 }
 0x547   :  { %2059 = vmatmul.mubr.msk.f32.vlgmr.msra.gmra.mxu1 %vm143_vm2, %v882_v18 }
 0x548   :  { %2068 = vmatprep.mubr.msk.f32.mxu1 %vm2229_vm1, %v2228_v6 }
 0x5ff   :  { %v2429_v19 = vpop.f32.mrf.mxu0 }
 0x601   :  { %v2045_v20 = vpop.f32.mrf.mxu0 }
 0x603   :  { %v2431_v21 = vpop.f32.mrf.mxu1  ;;  %v877_v22 = vpop.f32.mrf.mxu0 }
 0x604   :  { %v959_v23 = vmul.f32 0.35355338, %v877_v22 }
 0x605   :  { %v2050_v24 = vpop.f32.mrf.mxu1  ;;  %v2055_v25 = vpop.f32.mrf.mxu0 }
 0x606   :  { %v961_v26 = vsel %vm143_vm2, %v959_v23, -inf  ;;  %v1502_v24 = vld [vmem:[%s2603_s3 + $0x18] sm:$0xff]  ;;  %v1500_v25 = vld [vmem:[%s2603_s3 + $0x8] sm:$0xff] }
 0x607   :  { %v955_v27 = vpop.f32.mrf.mxu1  ;;  %962 = vmax.xlane.f32.xlu0 %v961_v26  ;;  %v1499_v26 = vld [vmem:[%s2603_s3] sm:$0xff] }
 0x608   :  { %v960_v28 = vmul.f32 0.35355338, %v955_v27 }
 0x609   :  { %v2060_v29 = vpop.f32.mrf.mxu1 }
 0x60a   :  { %v964_v30 = vsel %vm143_vm2, %v960_v28, -inf }
 0x60b   :  { %965 = vmax.xlane.f32.xlu1 %v964_v30 }
 0x61c   :  { %983 = vrot.lane.b32.xlu1 %v2351_v10, %s2237_s26 }
 0x61d   :  { %1059 = vrot.lane.b32.xlu0 %v2354_v11, %s2237_s26  ;;  %s2206_s26 = scalar_lea.vmem %s1884_s25, 256 }
 0x61e   :  { %p2207_p0 = scmp.ne.s32.totalorder %s1884_s25, %s2206_s26  ;;  %p2212_p2 = scmp.lt.s32.totalorder %s2206_s26, %s2206_s26 }
 0x620   :  { %1137 = vrot.lane.b32.xlu1 %v2351_v10, %s2238_s27  ;;  %p2213_p3 = por %p2212_p2, %p2211_p1 }
 0x622   :  { %p2214_p4 = pnand %p2213_p3, %p2207_p0 }
 0x624   :  { %1215 = vrot.lane.b32.xlu1 %v2354_v11, %s2238_s27 }
 0x628   :  { %1213 = vrot.lane.b32.xlu1 %v2354_v11, %s2239_s28 }
 0x690   :  { %v963_v31 = vpop.xlane.xlu0 %962 }
 0x691   :  { %v967_v32 = vsub.f32 %v959_v23, %v963_v31 }
 0x693   :  { %v969_v33 = vmul.f32 1.442695, %v967_v32 }
 0x694   :  { %v966_v34 = vpop.xlane.xlu1 %965  ;;  %v1060_v35 = vpop.permute.xlu0 %1059 }
 0x695   :  { %2182 = vpow2.f32 %v969_v33  ;;  %v968_v36 = vsub.f32 %v960_v28, %v966_v34  ;;  %2067 = vmatpush3.msra.mxu1 %v1060_v35 }
 0x696   :  { %2076 = vmatprep.subr.mxu1 %v2228_v6 }
 0x697   :  { %v971_v37 = vmul.f32 1.442695, %v968_v36 }
 0x698   :  { %v984_v38 = vpop.permute.xlu1 %983 }
 0x699   :  { %2184 = vpow2.f32 %v971_v37  ;;  %2062 = vmatpush3.msra.mxu0 %v984_v38 }
 0x69a   :  { %2071 = vmatprep.subr.mxu0 %v2228_v6 }
 0x69c   :  { %v1138_v47 = vpop.permute.xlu1 %1137 }
 0x6a0   :  { %v1216_v51 = vpop.permute.xlu1 %1215 }
 0x6a2   :  { %v2183_v39 = vpop.eup %2182 }
 0x6a3   :  { %v973_v40 = vsel %vm143_vm2, %v2183_v39, 0.0 }
 0x6a4   :  { %974 = vadd.xlane.f32.xlu0 %v973_v40  ;;  %v1214_v54 = vpop.permute.xlu1 %1213 }
 0x6a6   :  { %v2185_v41 = vpop.eup %2184 }
 0x6a7   :  { %v976_v42 = vsel %vm143_vm2, %v2185_v41, 0.0 }
 0x6a8   :  { %977 = vadd.xlane.f32.xlu0 %v976_v42 }
 0x6be   :  { %1135 = vrot.lane.b32.xlu0 %v2351_v10, %s2239_s28 }
 0x72d   :  { %v975_v43 = vpop.xlane.xlu0 %974 }
 0x72e   :  { %2186 = vrcp.f32 %v975_v43  ;;  %v1921_v43 = vld [vmem:[%s2604_s4] ss:$0 sm:$0xff] }
 0x731   :  { %v978_v45 = vpop.xlane.xlu0 %977 }
 0x732   :  { %2188 = vrcp.f32 %v978_v45 }
 0x735   :  { %v1136_v53 = vpop.permute.xlu0 %1135 }
 0x73b   :  { %v2187_v48 = vpop.eup %2186 }
 0x73c   :  { %v981_v49 = vmul.f32 %v2187_v48, %v2183_v39 }
 0x73e   :  { %2064 = vmatmul.mubr.msk.f32.vlgmr.msra.gmra.mxu0 %vm143_vm2, %v981_v49 }
 0x73f   :  { %v2189_v50 = vpop.eup %2188  ;;  %2072 = vmatpush3.xpose.msk.msra.mxu0 %vm143_vm2, %v1138_v47  ;;  %2073 = vmatprep.mubr.msk.f32.mxu0 %vm2229_vm1, %v2228_v6 }
 0x740   :  { %v982_v52 = vmul.f32 %v2189_v50, %v2185_v41  ;;  %2081 = vmatprep.subr.mxu0 %v2228_v6 }
 0x742   :  { %2069 = vmatmul.mubr.msk.f32.vlgmr.msra.gmra.mxu1 %vm143_vm2, %v982_v52  ;;  %2074 = vmatmul.mubr.msk.f32.vlgmr.msra.gmra.mxu0 %vm143_vm2, %v1136_v53 }
 0x743   :  { %2077 = vmatpush3.xpose.msk.msra.mxu1 %vm143_vm2, %v1216_v51  ;;  %2078 = vmatprep.mubr.msk.f32.mxu1 %vm2229_vm1, %v2228_v6 }
 0x744   :  { %2086 = vmatprep.subr.mxu1 %v2228_v6  ;;  %2083 = vmatprep.mubr.msk.f32.mxu0 %vm2229_vm1, %v2228_v6 }
 0x746   :  { %2079 = vmatmul.mubr.msk.f32.vlgmr.msra.gmra.mxu1 %vm143_vm2, %v1214_v54 }
 0x747   :  { %2088 = vmatprep.mubr.msk.f32.mxu1 %vm2229_vm1, %v2228_v6 }
 0x7fe   :  { %v1055_v55 = vpop.f32.mrf.mxu0 }
 0x800   :  { %v2065_v56 = vpop.f32.mrf.mxu0 }
 0x802   :  { %v1131_v57 = vpop.f32.mrf.mxu1  ;;  %v1209_v58 = vpop.f32.mrf.mxu0 }
 0x803   :  { %v1291_v59 = vmul.f32 0.35355338, %v1209_v58 }
 0x804   :  { %v2070_v60 = vpop.f32.mrf.mxu1  ;;  %v2075_v61 = vpop.f32.mrf.mxu0 }
 0x805   :  { %v1293_v62 = vsel %vm143_vm2, %v1291_v59, -inf  ;;  %v1641_v60 = vld [vmem:[%s2607_s7 + $0x18] sm:$0xff]  ;;  %v1640_v61 = vld [vmem:[%s2607_s7 + $0x10] sm:$0xff] }
 0x806   :  { %v1287_v63 = vpop.f32.mrf.mxu1  ;;  %1294 = vmax.xlane.f32.xlu0 %v1293_v62  ;;  %v1639_v62 = vld [vmem:[%s2607_s7 + $0x8] sm:$0xff] }
 0x807   :  { %v1292_v0 = vmul.f32 0.35355338, %v1287_v63  ;;  %v1638_v63 = vld [vmem:[%s2607_s7] sm:$0xff] }
 0x808   :  { %v2080_v1 = vpop.f32.mrf.mxu1 }
 0x809   :  { %v1296_v3 = vsel %vm143_vm2, %v1292_v0, -inf  ;;  %v1746_v1 = vld [vmem:[%s2609_s9 + $0x70] sm:$0xff] }
 0x80a   :  { %1297 = vmax.xlane.f32.xlu1 %v1296_v3  ;;  %v1745_v3 = vld [vmem:[%s2609_s9 + $0x68] sm:$0xff] }
 0x81b   :  { %1315 = vrot.lane.b32.xlu1 %v2351_v10, %s2240_s29 }
 0x81f   :  { %1469 = vrot.lane.b32.xlu1 %v2429_v19, %s2241_s30 }
 0x823   :  { %1471 = vrot.lane.b32.xlu1 %v2431_v21, %s2241_s30 }
 0x827   :  { %1479 = vrot.lane.b32.xlu1 %v1131_v57, %s2242_s14 }
 0x88f   :  { %v1295_v6 = vpop.xlane.xlu0 %1294 }
 0x890   :  { %v1299_v4 = vsub.f32 %v1291_v59, %v1295_v6  ;;  %v1744_v6 = vld [vmem:[%s2609_s9 + $0x60] sm:$0xff] }
 0x892   :  { %v1301_v7 = vmul.f32 1.442695, %v1299_v4  ;;  %v1743_v4 = vld [vmem:[%s2609_s9 + $0x58] sm:$0xff] }
 0x893   :  { %v1298_v8 = vpop.xlane.xlu1 %1297 }
 0x894   :  { %2190 = vpow2.f32 %v1301_v7  ;;  %v1300_v9 = vsub.f32 %v1292_v0, %v1298_v8  ;;  %v1747_v0 = vld [vmem:[%s2609_s9 + $0x78] sm:$0xff]  ;;  %v1742_v7 = vld [vmem:[%s2609_s9 + $0x50] sm:$0xff]  ;;  %v1741_v8 = vld [vmem:[%s2609_s9 + $0x48] sm:$0xff] }
 0x896   :  { %v1303_v12 = vmul.f32 1.442695, %v1300_v9  ;;  %v1740_v9 = vld [vmem:[%s2609_s9 + $0x40] sm:$0xff] }
 0x897   :  { %v1316_v13 = vpop.permute.xlu1 %1315 }
 0x898   :  { %2192 = vpow2.f32 %v1303_v12  ;;  %2082 = vmatpush3.msra.mxu0 %v1316_v13  ;;  %v1739_v12 = vld [vmem:[%s2609_s9 + $0x38] sm:$0xff]  ;;  %v1738_v13 = vld [vmem:[%s2609_s9 + $0x30] sm:$0xff] }
 0x899   :  { %2113 = vmatprep.subr.mxu0 %v1747_v0 }
 0x89b   :  { %v1470_v31 = vpop.permute.xlu1 %1469 }
 0x89c   :  { %v1491_v34 = vsel %vm143_vm2, %v2397_v44, %v1470_v31  ;;  %v1734_v31 = vld [vmem:[%s2609_s9 + $0x10] sm:$0xff] }
 0x89f   :  { %v1472_v32 = vpop.permute.xlu1 %1471 }
 0x8a0   :  { %v1492_v39 = vsel %vm143_vm2, %v2399_v46, %v1472_v32  ;;  %v1733_v32 = vld [vmem:[%s2609_s9 + $0x8] sm:$0xff] }
 0x8a1   :  { %v2191_v10 = vpop.eup %2190 }
 0x8a2   :  { %v1305_v14 = vsel %vm143_vm2, %v2191_v10, 0.0 }
 0x8a3   :  { %1306 = vadd.xlane.f32.xlu0 %v1305_v14  ;;  %v1480_v35 = vpop.permute.xlu1 %1479  ;;  %v1736_v14 = vld [vmem:[%s2609_s9 + $0x20] sm:$0xff] }
 0x8a4   :  { %v1495_v40 = vsel %vm1493_vm4, %v1492_v39, %v1480_v35 }
 0x8a5   :  { %v2193_v15 = vpop.eup %2192 }
 0x8a6   :  { %v1308_v16 = vsel %vm143_vm2, %v2193_v15, 0.0 }
 0x8a7   :  { %1309 = vadd.xlane.f32.xlu0 %v1308_v16 }
 0x8bd   :  { %1391 = vrot.lane.b32.xlu0 %v2354_v11, %s2240_s29  ;;  %v1501_v11 = vld [vmem:[%s2603_s3 + $0x10] sm:$0xff] }
 0x8c1   :  { %1477 = vrot.lane.b32.xlu0 %v1055_v55, %s2242_s14 }
 0x92c   :  { %v1307_v17 = vpop.xlane.xlu0 %1306 }
 0x92d   :  { %2194 = vrcp.f32 %v1307_v17 }
 0x930   :  { %v1310_v18 = vpop.xlane.xlu0 %1309 }
 0x931   :  { %2196 = vrcp.f32 %v1310_v18 }
 0x934   :  { %v1392_v19 = vpop.permute.xlu0 %1391 }
 0x935   :  { %2087 = vmatpush3.msra.mxu1 %v1392_v19 }
 0x936   :  { %2091 = vmatprep.subr.mxu1 %v1502_v24 }
 0x938   :  { %v1478_v33 = vpop.permute.xlu0 %1477 }
 0x939   :  { %v1494_v36 = vsel %vm1493_vm4, %v1491_v34, %v1478_v33  ;;  %v1732_v33 = vld [vmem:[%s2609_s9] sm:$0xff] }
 0x93a   :  { %v2195_v20 = vpop.eup %2194  ;;  %v1926_v34 = vld [vmem:[%s2608_s8] ss:$0 sm:$0xff] }
 0x93b   :  { %v1313_v21 = vmul.f32 %v2195_v20, %v2191_v10  ;;  %v1737_v10 = vld [vmem:[%s2609_s9 + $0x28] sm:$0xff] }
 0x93d   :  { %2084 = vmatmul.mubr.msk.f32.vlgmr.msra.gmra.mxu0 %vm143_vm2, %v1313_v21 }
 0x93e   :  { %v2197_v22 = vpop.eup %2196  ;;  %2114 = vmatpush3.msra.mxu0 %v1747_v0 }
 0x93f   :  { %v1314_v23 = vmul.f32 %v2197_v22, %v2193_v15  ;;  %2115 = vmatprep.subr.mxu0 %v1746_v1  ;;  %v1924_v22 = vld [vmem:[%s2605_s5] ss:$0 sm:$0xff] }
 0x940   :  { %2116 = vmatpush3.msra.mxu0 %v1746_v1  ;;  %v1930_v1 = vld [vmem:[%s2611_s11] ss:$0 sm:$0xff] }
 0x941   :  { %2089 = vmatmul.mubr.msk.f32.vlgmr.msra.gmra.mxu1 %vm143_vm2, %v1314_v23  ;;  %2117 = vmatprep.subr.mxu0 %v1745_v3 }
 0x942   :  { %2092 = vmatpush3.msra.mxu1 %v1502_v24  ;;  %2118 = vmatpush3.msra.mxu0 %v1745_v3  ;;  %v1925_v24 = vld [vmem:[%s2606_s6] ss:$0 sm:$0xff] }
 0x943   :  { %2093 = vmatprep.subr.mxu1 %v1501_v11  ;;  %2119 = vmatprep.subr.mxu0 %v1744_v6 }
 0x944   :  { %2094 = vmatpush3.msra.mxu1 %v1501_v11  ;;  %2120 = vmatpush3.msra.mxu0 %v1744_v6 }
 0x945   :  { %2095 = vmatprep.subr.mxu1 %v1500_v25  ;;  %2121 = vmatprep.subr.mxu0 %v1743_v4 }
 0x946   :  { %2096 = vmatpush3.msra.mxu1 %v1500_v25  ;;  %2122 = vmatpush3.msra.mxu0 %v1743_v4  ;;  %v1931_v4 = vld [vmem:[%s2612_s12] ss:$0 sm:$0xff] }
 0x947   :  { %2097 = vmatprep.subr.mxu1 %v1499_v26  ;;  %2123 = vmatprep.subr.mxu0 %v1742_v7 }
 0x948   :  { %2098 = vmatpush3.msra.mxu1 %v1499_v26  ;;  %2124 = vmatpush3.msra.mxu0 %v1742_v7 }
 0x949   :  { %2102 = vmatprep.subr.mxu1 %v1641_v60  ;;  %2125 = vmatprep.subr.mxu0 %v1741_v8 }
 0x94a   :  { %2126 = vmatpush3.msra.mxu0 %v1741_v8 }
 0x94b   :  { %2127 = vmatprep.subr.mxu0 %v1740_v9 }
 0x94c   :  { %2128 = vmatpush3.msra.mxu0 %v1740_v9 }
 0x94d   :  { %2129 = vmatprep.subr.mxu0 %v1739_v12 }
 0x94e   :  { %2130 = vmatpush3.msra.mxu0 %v1739_v12 }
 0x94f   :  { %2131 = vmatprep.subr.mxu0 %v1738_v13 }
 0x950   :  { %2132 = vmatpush3.msra.mxu0 %v1738_v13 }
 0x951   :  { %2133 = vmatprep.subr.mxu0 %v1737_v10 }
 0x952   :  { %2134 = vmatpush3.msra.mxu0 %v1737_v10 }
 0x953   :  { %2135 = vmatprep.subr.mxu0 %v1736_v14 }
 0x954   :  { %2136 = vmatpush3.msra.mxu0 %v1736_v14 }
 0x9fd   :  { %v1387_v27 = vpop.f32.mrf.mxu0 }
 0x9fe   :  { %1485 = vrot.lane.b32.xlu0 %v1387_v27, %s2243_s2 }
 0x9ff   :  { %v2085_v28 = vpop.f32.mrf.mxu0 }
 0xa01   :  { %v1463_v29 = vpop.f32.mrf.mxu1 }
 0xa02   :  { %1487 = vrot.lane.b32.xlu1 %v1463_v29, %s2243_s2 }
 0xa03   :  { %v2090_v30 = vpop.f32.mrf.mxu1 }
 0xa04   :  { %v1735_v30 = vld [vmem:[%s2609_s9 + $0x18] sm:$0xff] }
 0xa05   :  { %2137 = vmatprep.subr.mxu0 %v1735_v30 }
 0xa06   :  { %2138 = vmatpush3.msra.mxu0 %v1735_v30 }
 0xa07   :  { %2139 = vmatprep.subr.mxu0 %v1734_v31 }
 0xa08   :  { %2140 = vmatpush3.msra.mxu0 %v1734_v31 }
 0xa09   :  { %2141 = vmatprep.subr.mxu0 %v1733_v32 }
 0xa0a   :  { %2142 = vmatpush3.msra.mxu0 %v1733_v32 }
 0xa0b   :  { %2143 = vmatprep.subr.mxu0 %v1732_v33 }
 0xa0c   :  { %2144 = vmatpush3.msra.mxu0 %v1732_v33 }
 0xa70   :  { %v1486_v37 = vpop.permute.xlu0 %1485 }
 0xa71   :  { %v1497_v38 = vsel %vm1496_vm3, %v1494_v36, %v1486_v37 }
 0xa72   :  { %2099 = vmatprep.mubr.msk.f32.mxu1 %vm58_vm0, %v1497_v38 }
 0xa74   :  { %v1488_v41 = vpop.permute.xlu1 %1487 }
 0xa75   :  { %v1498_v42 = vsel %vm1496_vm3, %v1495_v40, %v1488_v41  ;;  %v1929_v41 = vld [vmem:[%s2610_s10] ss:$0 sm:$0xff] }
 0xa76   :  { %2100 = vmatmul.mubr.msk.f32.vlgmr.msra.gmra.mxu1 %vm58_vm0, %v1498_v42 }
 0xa77   :  { %2103 = vmatpush3.msra.mxu1 %v1641_v60 }
 0xa78   :  { %2104 = vmatprep.subr.mxu1 %v1640_v61 }
 0xa79   :  { %2105 = vmatpush3.msra.mxu1 %v1640_v61 }
 0xa7a   :  { %2106 = vmatprep.subr.mxu1 %v1639_v62 }
 0xa7b   :  { %2107 = vmatpush3.msra.mxu1 %v1639_v62 }
 0xa7c   :  { %2108 = vmatprep.subr.mxu1 %v1638_v63 }
 0xa7d   :  { %2109 = vmatpush3.msra.mxu1 %v1638_v63 }
 0xb36   :  { %v2101_v44 = vpop.f32.mrf.mxu1 }
 0xb37   :  { %v1588_v45 = vadd.f32 %v2101_v44, %v1921_v43 }
 0xb38   :  { %v1582_v47 = vpop.f32.mrf.mxu1 }
 0xb39   :  { %v1583_v48 = vadd.f32 %v1921_v43, %v1582_v47  ;;  %v1592_v49 = vadd.f32 %v1588_v45, %v2338_v5 }
 0xb3b   :  { %v1598_v50 = vsel %vm58_vm0, %v1592_v49, 0.0  ;;  %v1591_v51 = vadd.f32 %v1583_v48, %v2325_v2 }
 0xb3c   :  { %1599 = vadd.xlane.f32.xlu1 %v1598_v50 }
 0xb3d   :  { %v1595_v46 = vsel %vm58_vm0, %v1591_v51, 0.0 }
 0xb3e   :  { %1596 = vadd.xlane.f32.xlu0 %v1595_v46 }
 0xbc5   :  { %v1600_v52 = vpop.xlane.xlu1 %1599 }
 0xbc6   :  { %v1603_v53 = vmul.f32 0.03125, %v1600_v52 }
 0xbc7   :  { %v1597_v54 = vpop.xlane.xlu0 %1596 }
 0xbc8   :  { %v1602_v55 = vmul.f32 0.03125, %v1597_v54  ;;  %v2498_v56 = vsub.f32 %v1592_v49, %v1603_v53 }
 0xbca   :  { %v2500_v57 = vsub.f32 %v1591_v51, %v1602_v55  ;;  %v1607_v2 = vmul.f32 %v2498_v56, %v2498_v56 }
 0xbcc   :  { %v1606_v58 = vmul.f32 %v2500_v57, %v2500_v57  ;;  %v1611_v59 = vsel %vm58_vm0, %v1607_v2, 0.0 }
 0xbce   :  { %v1608_v5 = vsel %vm58_vm0, %v1606_v58, 0.0 }
 0xbcf   :  { %1609 = vadd.xlane.f32.xlu0 %v1608_v5 }
 0xbd3   :  { %1612 = vadd.xlane.f32.xlu0 %v1611_v59 }
 0xc58   :  { %v1610_v15 = vpop.xlane.xlu0 %1609 }
 0xc59   :  { %v1614_v16 = vmul.f32 0.03125, %v1610_v15 }
 0xc5b   :  { %v1616_v17 = vadd.f32 1e-05, %v1614_v16 }
 0xc5c   :  { %v1613_v18 = vpop.xlane.xlu0 %1612 }
 0xc5d   :  { %2198 = vrsqrt.f32 %v1616_v17  ;;  %v1615_v19 = vmul.f32 0.03125, %v1613_v18 }
 0xc5f   :  { %v1617_v20 = vadd.f32 1e-05, %v1615_v19 }
 0xc61   :  { %2200 = vrsqrt.f32 %v1617_v20 }
 0xc6a   :  { %v2199_v21 = vpop.eup %2198 }
 0xc6b   :  { %v1620_v23 = vmul.f32 %v2199_v21, %v2500_v57 }
 0xc6d   :  { %v1628_v11 = vmul.f32 %v1924_v22, %v1620_v23 }
 0xc6e   :  { %v2201_v25 = vpop.eup %2200 }
 0xc6f   :  { %v1621_v26 = vmul.f32 %v2201_v25, %v2498_v56  ;;  %v1636_v27 = vadd.f32 %v1925_v24, %v1628_v11 }
 0xc71   :  { %v1629_v28 = vmul.f32 %v1924_v22, %v1621_v26  ;;  %2110 = vmatprep.mubr.msk.f32.mxu1 %vm58_vm0, %v1636_v27 }
 0xc73   :  { %v1637_v29 = vadd.f32 %v1925_v24, %v1629_v28 }
 0xc75   :  { %2111 = vmatmul.mubr.msk.f32.vlgmr.msra.gmra.mxu1 %vm58_vm0, %v1637_v29 }
 0xd35   :  { %v2112_v35 = vpop.f32.mrf.mxu1 }
 0xd36   :  { %v1727_v36 = vadd.f32 %v2112_v35, %v1926_v34 }
 0xd37   :  { %v1721_v37 = vpop.f32.mrf.mxu1 }
 0xd38   :  { %v1722_v38 = vadd.f32 %v1926_v34, %v1721_v37  ;;  %v1731_v40 = vmax.f32 %v1727_v36, 0.0 }
 0xd3a   :  { %v1730_v39 = vmax.f32 %v1722_v38, 0.0 }
 0xd3c   :  { %2145 = vmatprep.mubr.f32.mxu0 %v1730_v39 }
 0xd3d   :  { %2146 = vmatmul.mubr.f32.vlgmr.msra.gmra.mxu0 %v1731_v40 }
 0xdfd   :  { %v2147_v42 = vpop.f32.mrf.mxu0 }
 0xdfe   :  { %v1827_v43 = vadd.f32 %v2147_v42, %v1929_v41 }
 0xdff   :  { %v1821_v44 = vpop.f32.mrf.mxu0 }
 0xe00   :  { %v1822_v45 = vadd.f32 %v1929_v41, %v1821_v44  ;;  %v1831_v47 = vadd.f32 %v1827_v43, %v1637_v29 }
 0xe02   :  { %v1837_v48 = vsel %vm58_vm0, %v1831_v47, 0.0  ;;  %v1830_v49 = vadd.f32 %v1822_v45, %v1636_v27 }
 0xe03   :  { %1838 = vadd.xlane.f32.xlu0 %v1837_v48 }
 0xe04   :  { %v1834_v50 = vsel %vm58_vm0, %v1830_v49, 0.0 }
 0xe05   :  { %1835 = vadd.xlane.f32.xlu1 %v1834_v50 }
 0xe8c   :  { %v1839_v51 = vpop.xlane.xlu0 %1838 }
 0xe8d   :  { %v1841_v46 = vmul.f32 0.03125, %v1839_v51 }
 0xe8e   :  { %v1836_v52 = vpop.xlane.xlu1 %1835 }
 0xe8f   :  { %v1843_v53 = vsub.f32 %v1831_v47, %v1841_v46  ;;  %v1840_v54 = vmul.f32 0.03125, %v1836_v52 }
 0xe91   :  { %v1842_v55 = vsub.f32 %v1830_v49, %v1840_v54  ;;  %v1845_v56 = vmul.f32 %v1843_v53, %v1843_v53 }
 0xe93   :  { %v1849_v57 = vsel %vm58_vm0, %v1845_v56, 0.0  ;;  %v1844_v58 = vmul.f32 %v1842_v55, %v1842_v55 }
 0xe94   :  { %1850 = vadd.xlane.f32.xlu0 %v1849_v57 }
 0xe95   :  { %v1846_v5 = vsel %vm58_vm0, %v1844_v58, 0.0 }
 0xe96   :  { %1847 = vadd.xlane.f32.xlu1 %v1846_v5 }
 0xf1d   :  { %v1851_v2 = vpop.xlane.xlu0 %1850 }
 0xf1e   :  { %v1853_v59 = vmul.f32 0.03125, %v1851_v2 }
 0xf1f   :  { %v1848_v60 = vpop.xlane.xlu1 %1847 }
 0xf20   :  { %v1855_v61 = vadd.f32 1e-05, %v1853_v59  ;;  %v1852_v62 = vmul.f32 0.03125, %v1848_v60 }
 0xf22   :  { %2202 = vrsqrt.f32 %v1855_v61  ;;  %v1854_v63 = vadd.f32 1e-05, %v1852_v62 }
 0xf24   :  { %2204 = vrsqrt.f32 %v1854_v63 }
 0xf2f   :  { %v2203_v0 = vpop.eup %2202 }
 0xf30   :  { %v1859_v3 = vmul.f32 %v2203_v0, %v1843_v53 }
 0xf31   :  { %v2205_v6 = vpop.eup %2204 }
 0xf32   :  { %v1858_v7 = vmul.f32 %v2205_v6, %v1842_v55  ;;  %v1867_v8 = vmul.f32 %v1930_v1, %v1859_v3 }
 0xf34   :  { %v1866_v9 = vmul.f32 %v1930_v1, %v1858_v7  ;;  %v1875_v12 = vadd.f32 %v1931_v4, %v1867_v8 }
 0xf36   :  { %v1874_v13 = vadd.f32 %v1931_v4, %v1866_v9  ;;  %1877 = vst.msk [vmem:[#allocation2 + $0x8] sm:$0xff] %vm58_vm0, %v1875_v12 }
 0xf38   :  { %1876 = vst.msk [vmem:[#allocation2] sm:$0xff] %vm58_vm0, %v1874_v13 }
 0xf39   :  { %2217 = shalt.err (!%p2214_p4)
}
 0xf3a   :  { %s2245_s11 = smov 128  }
 0xf3b   :  { %1889 = dma.vmem_to_hbm [thread:$0]  %s1884_s25, 256, %s2613_s13, [#allocation3], %s2245_s11, %s2245_s11, %s2241_s30  }
 0xf3c   :  { %2226 = dma.done.wait [#allocation3], 256  }
 0xf3d   :  { %2227 = vsyncadd [#allocation3], 4294967040 }
 0xf3e   :  { %1893 = vsyncpa [#allocation3], 1 }

</bundles_post_ra>
